<compile_context>
chip_gen: v6e
topology: v6e:2x2x1
jax: 0.10.0
libtpu: 0.0.40
codegen_flags: <defaults>
</compile_context>

<pallas_src>
import jax
import jax.numpy as jnp
from jax.experimental import pallas as pl
from jax.experimental.pallas import tpu as pltpu


SUBLANE = 8      # f32 sublane width
TB_MAX = 4096    # rows per grid step; big tiles amortize the ~0.35us/step cost
                 # while double-buffered blocks (~8 MiB) fit v5e/v6e/v7x
                 # default scoped-VMEM budgets.


def mlp_kernel(x_ref, w0_ref, b0_ref, w1_ref, b1_ref, o_ref):
    # Layer 0: Linear + ReLU (MXU matmul with f32 accumulation, VPU bias/relu).
    h = jnp.dot(x_ref[...], w0_ref[...], preferred_element_type=jnp.float32)
    h = jnp.maximum(h + b0_ref[...], 0.0)
    # Layer 1 (output layer): Linear, no activation. h stays f32 into the MXU
    # (explicit f32 accumulation; no downcast even if weights are ever bf16).
    out = jnp.dot(h, w1_ref[...], preferred_element_type=jnp.float32)
    # Narrow (tb, C) store: masked vst in-kernel (cheap), narrow DMA to HBM.
    o_ref[...] = (out + b1_ref[...]).astype(o_ref.dtype)


@jax.jit
def mlp_forward(x, w0, b0, w1, b1):
    """x: [B, D_in]; w0: [D_in, H]; b0: [1, H]; w1: [H, C]; b1: [1, C]."""
    B, D_in = x.shape
    H = w0.shape[1]
    C = w1.shape[1]

    # Row tile: whole batch as one full-extent block when it fits (legal:
    # block dims equal to the full array dims bypass the (8,128) rule),
    # otherwise TB_MAX-row tiles with a cdiv grid. No wrapper-side padding of
    # x: Pallas masks the ragged last block's writes, and rows are independent
    # so the padded rows of that block are harmless.
    tb = B if B <= TB_MAX else TB_MAX
    grid = (pl.cdiv(B, tb),)

    # Scheduler hint for XLA (this MLP is usually one node in a larger graph).
    flops = 2 * B * (D_in * H + H * C)
    bytes_accessed = 4 * (B * D_in + B * C + D_in * H + H + H * C + C)
    cost = pl.CostEstimate(flops=flops, transcendentals=0,
                           bytes_accessed=bytes_accessed)

    return pl.pallas_call(
        mlp_kernel,
        out_shape=jax.ShapeDtypeStruct((B, C), x.dtype),
        grid=grid,
        in_specs=[
            # x: tiled over batch, double-buffered by the pipeline.
            pl.BlockSpec((tb, D_in), lambda i: (i, 0)),
            # Weights / biases: constant index_map -> resident in VMEM.
            pl.BlockSpec((D_in, H), lambda i: (0, 0)),
            pl.BlockSpec((1, H), lambda i: (0, 0)),
            pl.BlockSpec((H, C), lambda i: (0, 0)),
            pl.BlockSpec((1, C), lambda i: (0, 0)),
        ],
        # Narrow output block: last dim equals the full array dim (C), so the
        # HBM writeback only moves C*4 bytes per row.
        out_specs=pl.BlockSpec((tb, C), lambda i: (i, 0)),
        compiler_params=pltpu.CompilerParams(
            # Batch tiles are independent -> shard across TCs on v7x megacore.
            dimension_semantics=("parallel",),
        ),
        cost_estimate=cost,
    )(x, w0, b0, w1, b1)


def init_params(key, input_size, hidden_size=32, C=3, dtype=jnp.float32):
    """Deterministic init matching PyTorch nn.Linear default U(-1/sqrt(in), 1/sqrt(in))."""
    k0w, k0b, k1w, k1b = jax.random.split(key, 4)
    bound0 = 1.0 / jnp.sqrt(input_size)
    bound1 = 1.0 / jnp.sqrt(hidden_size)
    # Stored as [in, out] (transpose of PyTorch's [out, in]).
    w0 = jax.random.uniform(k0w, (input_size, hidden_size), dtype, -bound0, bound0)
    b0 = jax.random.uniform(k0b, (1, hidden_size), dtype, -bound0, bound0)
    w1 = jax.random.uniform(k1w, (hidden_size, C), dtype, -bound1, bound1)
    b1 = jax.random.uniform(k1b, (1, C), dtype, -bound1, bound1)
    return w0, b0, w1, b1


def reference_forward(x, w0, b0, w1, b1):
    h = jnp.maximum(x @ w0 + b0, 0.0)
    return h @ w1 + b1


if __name__ == "__main__":
    key = jax.random.PRNGKey(0)
    kx, kp = jax.random.split(key)

    batch = 64
    input_size = 16
    hidden_size = 32
    C = 3

    x = jax.random.normal(kx, (batch, input_size), jnp.float32)
    w0, b0, w1, b1 = init_params(kp, input_size, hidden_size, C)

    out = jax.block_until_ready(mlp_forward(x, w0, b0, w1, b1))
    ref = reference_forward(x, w0, b0, w1, b1)
    assert out.shape == (batch, C), out.shape
    assert jnp.allclose(out, ref, atol=1e-5, rtol=1e-5), "mismatch vs reference"

    # Single-block path with a batch that is not a multiple of 8 (full-extent
    # block, no padding anywhere).
    x2 = jax.random.normal(jax.random.PRNGKey(1), (1030, input_size), jnp.float32)
    out2 = jax.block_until_ready(mlp_forward(x2, w0, b0, w1, b1))
    ref2 = reference_forward(x2, w0, b0, w1, b1)
    assert out2.shape == (1030, C), out2.shape
    assert jnp.allclose(out2, ref2, atol=1e-5, rtol=1e-5), "mismatch vs reference (single block)"

    # Multi-step grid with a ragged last tile (no wrapper-side jnp.pad of x).
    x3 = jax.random.normal(jax.random.PRNGKey(2), (2 * TB_MAX + 8, input_size), jnp.float32)
    out3 = jax.block_until_ready(mlp_forward(x3, w0, b0, w1, b1))
    ref3 = reference_forward(x3, w0, b0, w1, b1)
    assert out3.shape == (2 * TB_MAX + 8, C), out3.shape
    assert jnp.allclose(out3, ref3, atol=1e-5, rtol=1e-5), "mismatch vs reference (tiled, ragged)"

    print("KERNEL_OK")
</pallas_src>

<mosaic_0001>
module attributes {stable_mosaic.version = 11 : i64} {
  func.func @mlp_kernel(%arg0: i32, %arg1: memref<64x16xf32, #tpu.memory_space<vmem>>, %arg2: memref<16x32xf32, #tpu.memory_space<vmem>>, %arg3: memref<1x32xf32, #tpu.memory_space<vmem>>, %arg4: memref<32x3xf32, #tpu.memory_space<vmem>>, %arg5: memref<1x3xf32, #tpu.memory_space<vmem>>, %arg6: memref<64x3xf32, #tpu.memory_space<vmem>>) attributes {dimension_semantics = [#tpu.dimension_semantics<parallel>], iteration_bounds = array<i64: 1>, scalar_prefetch = 0 : i64, scratch_operands = 0 : i64, tpu.core_type = #tpu.core_type<tc>, window_params = [{transform_indices = @transform_0, window_bounds = array<i64: 64, 16>}, {pipeline_mode = #tpu.pipeline_mode<synchronous>, transform_indices = @transform_1, window_bounds = array<i64: 16, 32>}, {pipeline_mode = #tpu.pipeline_mode<synchronous>, transform_indices = @transform_2, window_bounds = array<i64: 1, 32>}, {pipeline_mode = #tpu.pipeline_mode<synchronous>, transform_indices = @transform_3, window_bounds = array<i64: 32, 3>}, {pipeline_mode = #tpu.pipeline_mode<synchronous>, transform_indices = @transform_4, window_bounds = array<i64: 1, 3>}, {transform_indices = @transform_5, window_bounds = array<i64: 64, 3>}]} {
    %c0 = arith.constant 0 : index
    %c0_0 = arith.constant 0 : index
    %0 = vector.load %arg1[%c0, %c0_0] : memref<64x16xf32, #tpu.memory_space<vmem>>, vector<64x16xf32>
    %c0_1 = arith.constant 0 : index
    %c0_2 = arith.constant 0 : index
    %1 = vector.load %arg2[%c0_1, %c0_2] : memref<16x32xf32, #tpu.memory_space<vmem>>, vector<16x32xf32>
    %cst = arith.constant dense<0.000000e+00> : vector<64x32xf32>
    %2 = tpu.matmul %0, %1, %cst {dimension_numbers = #tpu.dot_dimension_numbers<[1], [0], [0], [1], [0, 0, 1, 1], [], []>} : vector<64x16xf32>, vector<16x32xf32>, vector<64x32xf32> -> vector<64x32xf32>
    %c0_3 = arith.constant 0 : index
    %c0_4 = arith.constant 0 : index
    %3 = vector.load %arg3[%c0_3, %c0_4] : memref<1x32xf32, #tpu.memory_space<vmem>>, vector<1x32xf32>
    %4 = vector.broadcast %3 : vector<1x32xf32> to vector<64x32xf32>
    %5 = arith.addf %2, %4 : vector<64x32xf32>
    %cst_5 = arith.constant 0.000000e+00 : f32
    %6 = vector.broadcast %cst_5 : f32 to vector<64x32xf32>
    %7 = arith.maximumf %5, %6 : vector<64x32xf32>
    %c0_6 = arith.constant 0 : index
    %c0_7 = arith.constant 0 : index
    %8 = vector.load %arg4[%c0_6, %c0_7] : memref<32x3xf32, #tpu.memory_space<vmem>>, vector<32x3xf32>
    %cst_8 = arith.constant dense<0.000000e+00> : vector<64x3xf32>
    %9 = tpu.matmul %7, %8, %cst_8 {dimension_numbers = #tpu.dot_dimension_numbers<[1], [0], [0], [1], [0, 0, 1, 1], [], []>} : vector<64x32xf32>, vector<32x3xf32>, vector<64x3xf32> -> vector<64x3xf32>
    %c0_9 = arith.constant 0 : index
    %c0_10 = arith.constant 0 : index
    %10 = vector.load %arg5[%c0_9, %c0_10] : memref<1x3xf32, #tpu.memory_space<vmem>>, vector<1x3xf32>
    %11 = vector.broadcast %10 : vector<1x3xf32> to vector<64x3xf32>
    %12 = arith.addf %9, %11 : vector<64x3xf32>
    %c0_11 = arith.constant 0 : index
    %c0_12 = arith.constant 0 : index
    %13 = vector.load %arg6[%c0_11, %c0_12] : memref<64x3xf32, #tpu.memory_space<vmem>>, vector<64x3xf32>
    tpu.vector_store %arg6[%c0_11, %c0_12], %12 {strides = array<i32>} : memref<64x3xf32, #tpu.memory_space<vmem>>, vector<64x3xf32>,
    return
  }
  func.func @transform_0(%arg0: i32) -> (i32, i32) {
    %c0_i32 = arith.constant 0 : i32
    %c0_i32_0 = arith.constant 0 : i32
    return %arg0, %c0_i32 : i32, i32
  }
  func.func @transform_1(%arg0: i32) -> (i32, i32) {
    %c0_i32 = arith.constant 0 : i32
    %c0_i32_0 = arith.constant 0 : i32
    %c0_i32_1 = arith.constant 0 : i32
    return %c0_i32, %c0_i32_0 : i32, i32
  }
  func.func @transform_2(%arg0: i32) -> (i32, i32) {
    %c0_i32 = arith.constant 0 : i32
    %c0_i32_0 = arith.constant 0 : i32
    %c0_i32_1 = arith.constant 0 : i32
    return %c0_i32, %c0_i32_0 : i32, i32
  }
  func.func @transform_3(%arg0: i32) -> (i32, i32) {
    %c0_i32 = arith.constant 0 : i32
    %c0_i32_0 = arith.constant 0 : i32
    %c0_i32_1 = arith.constant 0 : i32
    return %c0_i32, %c0_i32_0 : i32, i32
  }
  func.func @transform_4(%arg0: i32) -> (i32, i32) {
    %c0_i32 = arith.constant 0 : i32
    %c0_i32_0 = arith.constant 0 : i32
    %c0_i32_1 = arith.constant 0 : i32
    return %c0_i32, %c0_i32_0 : i32, i32
  }
  func.func @transform_5(%arg0: i32) -> (i32, i32) {
    %c0_i32 = arith.constant 0 : i32
    %c0_i32_0 = arith.constant 0 : i32
    return %arg0, %c0_i32 : i32, i32
  }
}

</mosaic_0001>

<bundles_post_ra>
// kernel: mlp_forward.1
= control target key start
LH: loop header
LB: loop body
LE: loop exit
PB: predicated region body
PF: predicated region fallthrough
CT: control target
= control target key end

     0   :  { %vm37_vm0 = vcmask 130048   ;;  %vm186_vm1 = vcmask 261120   ;;  %vm316_vm2 = vcmask 23552   ;;  %s531_s1 = inlined_call_operand.vmem [shape: f32[16,32], index: 1, kind: input, shape index: {}]   ;;  %s532_s0 = inlined_call_operand.vmem [shape: f32[64,16], index: 0, kind: input, shape index: {}]   ;;  %s533_s3 = inlined_call_operand.vmem [shape: f32[32,3], index: 3, kind: input, shape index: {}]   ;;  %s534_s2 = inlined_call_operand.vmem [shape: f32[1,32], index: 2, kind: input, shape index: {}]   ;;  %s535_s4 = inlined_call_operand.vmem [shape: f32[1,3], index: 4, kind: input, shape index: {}]   ;;  %s536_s5 = inlined_call_operand.vmem [shape: f32[64,3], index: 5, kind: output, shape index: {}]  }
   0x1   :  { %v29_v0 = vld [vmem:[%s531_s1 + $0x8] sm:$0xff]  ;;  %v28_v1 = vld [vmem:[%s531_s1] sm:$0xff]  ;;  %v22_v4 = vld [vmem:[%s532_s0 + $0x10] sm:$0xff] }
   0x2   :  { %v20_v2 = vld [vmem:[%s532_s0] sm:$0xff]  ;;  %369 = vmatprep.subr.mxu0 %v29_v0  ;;  %v21_v3 = vld [vmem:[%s532_s0 + $0x8] sm:$0xff]  ;;  %v23_v5 = vld [vmem:[%s532_s0 + $0x18] sm:$0xff] }
   0x3   :  { %373 = vmatprep.mubr.msk.f32.mxu0 %vm37_vm0, %v20_v2  ;;  %370 = vmatpush3.msra.mxu0 %v29_v0  ;;  %v24_v6 = vld [vmem:[%s532_s0 + $0x20] sm:$0xff]  ;;  %v25_v7 = vld [vmem:[%s532_s0 + $0x28] sm:$0xff]  ;;  %v26_v8 = vld [vmem:[%s532_s0 + $0x30] sm:$0xff] }
   0x4   :  { %371 = vmatprep.subr.mxu0 %v28_v1  ;;  %v27_v9 = vld [vmem:[%s532_s0 + $0x38] sm:$0xff]  ;;  %v177_v11 = vld [vmem:[%s533_s3 + $0x10] sm:$0xff]  ;;  %v176_v12 = vld [vmem:[%s533_s3 + $0x8] sm:$0xff] }
   0x5   :  { %372 = vmatpush3.msra.mxu0 %v28_v1  ;;  %v178_v10 = vld [vmem:[%s533_s3 + $0x18] sm:$0xff]  ;;  %v175_v13 = vld [vmem:[%s533_s3] sm:$0xff] }
   0x6   :  { %374 = vmatmul.mubr.msk.f32.vlgmr.msra.gmra.mxu0 %vm37_vm0, %v21_v3  ;;  %385 = vmatprep.subr.mxu1 %v178_v10  ;;  %v329_v14 = vld [vmem:[%s534_s2] ss:$0 sm:$0xff] }
   0x7   :  { %376 = vmatprep.mubr.msk.f32.mxu0 %vm37_vm0, %v22_v4  ;;  %386 = vmatpush3.msra.mxu1 %v178_v10  ;;  %v338_v39 = vld [vmem:[%s535_s4] ss:$0 sm:$0xff] }
   0x8   :  { %387 = vmatprep.subr.mxu1 %v177_v11 }
   0x9   :  { %388 = vmatpush3.msra.mxu1 %v177_v11 }
   0xa   :  { %377 = vmatmul.mubr.msk.f32.gmra.mxu0 %vm37_vm0, %v23_v5  ;;  %389 = vmatprep.subr.mxu1 %v176_v12 }
   0xb   :  { %379 = vmatprep.mubr.msk.f32.mxu0 %vm37_vm0, %v24_v6  ;;  %390 = vmatpush3.msra.mxu1 %v176_v12 }
   0xc   :  { %391 = vmatprep.subr.mxu1 %v175_v13 }
   0xd   :  { %392 = vmatpush3.msra.mxu1 %v175_v13 }
   0xe   :  { %380 = vmatmul.mubr.msk.f32.gmra.mxu0 %vm37_vm0, %v25_v7 }
   0xf   :  { %382 = vmatprep.mubr.msk.f32.mxu0 %vm37_vm0, %v26_v8 }
  0x12   :  { %383 = vmatmul.mubr.msk.f32.gmra.mxu0 %vm37_vm0, %v27_v9 }
  0xc6   :  { %v375_v15 = vpop.f32.mrf.mxu0 }
  0xc7   :  { %v134_v16 = vadd.f32 %v375_v15, %v329_v14 }
  0xc8   :  { %v128_v17 = vpop.f32.mrf.mxu0 }
  0xc9   :  { %v129_v18 = vadd.f32 %v329_v14, %v128_v17  ;;  %v168_v21 = vmax.f32 %v134_v16, 0.0 }
  0xca   :  { %v378_v19 = vpop.f32.mrf.mxu0 }
  0xcb   :  { %v167_v20 = vmax.f32 %v129_v18, 0.0  ;;  %v144_v22 = vadd.f32 %v378_v19, %v329_v14 }
  0xcc   :  { %v138_v23 = vpop.f32.mrf.mxu0 }
  0xcd   :  { %v139_v24 = vadd.f32 %v329_v14, %v138_v23  ;;  %393 = vmatprep.mubr.msk.f32.mxu1 %vm186_vm1, %v167_v20  ;;  %v170_v27 = vmax.f32 %v144_v22, 0.0 }
  0xce   :  { %v381_v25 = vpop.f32.mrf.mxu0  ;;  %394 = vmatmul.mubr.msk.f32.vlgmr.msra.gmra.mxu1 %vm186_vm1, %v168_v21 }
  0xcf   :  { %v169_v26 = vmax.f32 %v139_v24, 0.0  ;;  %v154_v28 = vadd.f32 %v381_v25, %v329_v14 }
  0xd0   :  { %v148_v29 = vpop.f32.mrf.mxu0 }
  0xd1   :  { %v149_v30 = vadd.f32 %v329_v14, %v148_v29  ;;  %396 = vmatprep.mubr.msk.f32.mxu1 %vm186_vm1, %v169_v26  ;;  %v172_v33 = vmax.f32 %v154_v28, 0.0 }
  0xd2   :  { %v384_v31 = vpop.f32.mrf.mxu0  ;;  %397 = vmatmul.mubr.msk.f32.gmra.mxu1 %vm186_vm1, %v170_v27 }
  0xd3   :  { %v171_v32 = vmax.f32 %v149_v30, 0.0  ;;  %v164_v34 = vadd.f32 %v384_v31, %v329_v14 }
  0xd4   :  { %v158_v35 = vpop.f32.mrf.mxu0 }
  0xd5   :  { %v159_v36 = vadd.f32 %v329_v14, %v158_v35  ;;  %399 = vmatprep.mubr.msk.f32.mxu1 %vm186_vm1, %v171_v32  ;;  %v174_v38 = vmax.f32 %v164_v34, 0.0 }
  0xd6   :  { %400 = vmatmul.mubr.msk.f32.gmra.mxu1 %vm186_vm1, %v172_v33 }
  0xd7   :  { %v173_v37 = vmax.f32 %v159_v36, 0.0 }
  0xd9   :  { %402 = vmatprep.mubr.msk.f32.mxu1 %vm186_vm1, %v173_v37 }
  0xda   :  { %403 = vmatmul.mubr.msk.f32.gmra.mxu1 %vm186_vm1, %v174_v38 }
 0x18e   :  { %v395_v40 = vpop.f32.mrf.mxu1 }
 0x18f   :  { %v283_v41 = vadd.f32 %v395_v40, %v338_v39 }
 0x190   :  { %v277_v42 = vpop.f32.mrf.mxu1 }
 0x191   :  { %318 = vst.msk [vmem:[%s536_s5 + $0x8] sm:$0xff] %vm316_vm2, %v283_v41  ;;  %v278_v43 = vadd.f32 %v338_v39, %v277_v42 }
 0x192   :  { %v398_v44 = vpop.f32.mrf.mxu1 }
 0x193   :  { %317 = vst.msk [vmem:[%s536_s5] sm:$0xff] %vm316_vm2, %v278_v43  ;;  %v293_v45 = vadd.f32 %v398_v44, %v338_v39 }
 0x194   :  { %v287_v46 = vpop.f32.mrf.mxu1 }
 0x195   :  { %320 = vst.msk [vmem:[%s536_s5 + $0x18] sm:$0xff] %vm316_vm2, %v293_v45  ;;  %v288_v47 = vadd.f32 %v338_v39, %v287_v46 }
 0x196   :  { %v401_v48 = vpop.f32.mrf.mxu1 }
 0x197   :  { %319 = vst.msk [vmem:[%s536_s5 + $0x10] sm:$0xff] %vm316_vm2, %v288_v47  ;;  %v303_v49 = vadd.f32 %v401_v48, %v338_v39 }
 0x198   :  { %v297_v50 = vpop.f32.mrf.mxu1 }
 0x199   :  { %322 = vst.msk [vmem:[%s536_s5 + $0x28] sm:$0xff] %vm316_vm2, %v303_v49  ;;  %v298_v51 = vadd.f32 %v338_v39, %v297_v50 }
 0x19a   :  { %v404_v52 = vpop.f32.mrf.mxu1 }
 0x19b   :  { %321 = vst.msk [vmem:[%s536_s5 + $0x20] sm:$0xff] %vm316_vm2, %v298_v51  ;;  %v313_v53 = vadd.f32 %v404_v52, %v338_v39 }
 0x19c   :  { %v307_v54 = vpop.f32.mrf.mxu1 }
 0x19d   :  { %324 = vst.msk [vmem:[%s536_s5 + $0x38] sm:$0xff] %vm316_vm2, %v313_v53  ;;  %v308_v55 = vadd.f32 %v338_v39, %v307_v54 }
 0x19f   :  { %323 = vst.msk [vmem:[%s536_s5 + $0x30] sm:$0xff] %vm316_vm2, %v308_v55 }

</bundles_post_ra>
